<compile_context>
chip_gen: v5e
topology: v5e:2x2
jax: 0.10.0
libtpu: 0.0.40
codegen_flags: <defaults>
</compile_context>

<pallas_src>
import jax
import jax.numpy as jnp
from jax.experimental import pallas as pl
from jax.experimental.pallas import tpu as pltpu

# ----------------------------- configuration -----------------------------
NUM_MODELS = 10          # boost ensemble size
VOCAB = 50               # char vocab size
EMBED = 16               # embedding dim
LEN_X = 12               # title (x) sequence length
LEN_Y = 20               # content (y) sequence length
KERNEL_SIZES = (2, 3, 4) # TextCNN conv kernel widths
FILTERS = 8              # filters per kernel size
NUM_CLASSES = 5          # logit dim
BATCH = 2
FEAT_DIM = 2 * len(KERNEL_SIZES) * FILTERS   # 48 : x-branch + y-branch concat
NF = NUM_MODELS * FILTERS                    # 80 : ensemble folded into matmul N
NUM_COMBOS = 2 * len(KERNEL_SIZES)           # 6  : (branch, kernel-size) pairs


# ------------------------------ Pallas kernel -----------------------------
def _ensemble_kernel(xc2, xc3, xc4, yc2, yc3, yc4,
                     wx2, wx3, wx4, wy2, wy3, wy4,
                     bias_ref, fcw_ref, fcb_ref, out_ref):
    """Single invocation: all 10 ensemble members folded into N=80 matmuls."""

    def combo_logits(col_ref, w_ref, combo):
        col = col_ref[...]                           # (B*P, k*E), matmul-ready
        p = col.shape[0] // BATCH                    # static
        # conv for all 10 models at once: N = 10*F = 80 columns on the MXU.
        h = jnp.dot(col, w_ref[...], preferred_element_type=jnp.float32)
        h = jnp.maximum(h + bias_ref[combo], 0.0)    # bias (1, 80) broadcast + ReLU
        # max-over-time per batch row (B=2 -> two static row slices, no reshape).
        f0 = jnp.max(h[:p, :], axis=0, keepdims=True)
        f1 = jnp.max(h[p:, :], axis=0, keepdims=True)
        feats = jnp.concatenate([f0, f1], axis=0)    # (B, 80)
        # Partial FC: fcw rows are (model, filter)-stacked, so this single
        # matmul already sums the per-model logit contributions of this combo.
        return jnp.dot(feats, fcw_ref[combo], preferred_element_type=jnp.float32)

    logits = (combo_logits(xc2, wx2, 0) + combo_logits(xc3, wx3, 1)
              + combo_logits(xc4, wx4, 2) + combo_logits(yc2, wy2, 3)
              + combo_logits(yc3, wy3, 4) + combo_logits(yc4, wy4, 5))
    out_ref[...] = logits + fcb_ref[...]             # summed ensemble FC bias


# --------------------------------- wrapper ---------------------------------
@jax.jit
def boost_cnn10_char(x_ids, y_ids, params):
    embed = params["embed"]                          # (VOCAB, E) shared table
    emb_x = embed[x_ids]                             # (B, Lx, E)
    emb_y = embed[y_ids]                             # (B, Ly, E)

    def im2col2d(emb, k):
        B, L, E = emb.shape
        P = L - k + 1
        col = jnp.concatenate([emb[:, j:j + P, :] for j in range(k)], axis=-1)
        return col.reshape(B * P, k * E)             # 2-D, matmul-ready

    cols_x = [im2col2d(emb_x, k) for k in KERNEL_SIZES]
    cols_y = [im2col2d(emb_y, k) for k in KERNEL_SIZES]

    # Fold the 10-model ensemble into the matmul N dimension.
    def stack_w(w, branch):                          # (10, 2, kE, F) -> (kE, 80)
        return jnp.transpose(w[:, branch], (1, 0, 2)).reshape(w.shape[2], NF)

    def stack_b(b, branch):                          # (10, 2, 1, F) -> (1, 80)
        return b[:, branch].reshape(1, NF)

    conv_ws = ([stack_w(params[f"w{k}"], 0) for k in KERNEL_SIZES]
               + [stack_w(params[f"w{k}"], 1) for k in KERNEL_SIZES])
    biases = jnp.stack(
        [stack_b(params[f"b{k}"], 0) for k in KERNEL_SIZES]
        + [stack_b(params[f"b{k}"], 1) for k in KERNEL_SIZES], axis=0)  # (6, 1, 80)

    # Final FC restacked per (branch, k) combo so rows are (model, filter):
    # feats_i (B, 80) @ fcw_block_i (80, 5) implicitly sums over the 10 models.
    fcw_blocks = jnp.stack(
        [params["wfc"][:, i * FILTERS:(i + 1) * FILTERS, :].reshape(NF, NUM_CLASSES)
         for i in range(NUM_COMBOS)], axis=0)                           # (6, 80, 5)
    fcb_sum = jnp.sum(params["bfc"], axis=0)                            # (1, 5)

    inputs = cols_x + cols_y + conv_ws + [biases, fcw_blocks, fcb_sum]

    vmem = pl.BlockSpec(memory_space=pltpu.MemorySpace.VMEM)
    return pl.pallas_call(
        _ensemble_kernel,
        out_shape=jax.ShapeDtypeStruct((BATCH, NUM_CLASSES), jnp.float32),
        in_specs=[vmem] * len(inputs),
        out_specs=vmem,
    )(*inputs)


# ----------------------------- pure-JAX reference -------------------------
def reference_forward(x_ids, y_ids, params):
    embed = params["embed"]
    emb_x = embed[x_ids]
    emb_y = embed[y_ids]

    def im2col(emb, k):
        B, L, E = emb.shape
        P = L - k + 1
        return jnp.concatenate([emb[:, j:j + P, :] for j in range(k)], axis=-1)

    logits = jnp.zeros((BATCH, NUM_CLASSES), jnp.float32)
    wkeys = {2: "w2", 3: "w3", 4: "w4"}
    bkeys = {2: "b2", 3: "b3", 4: "b4"}
    for m in range(NUM_MODELS):
        feats = []
        for branch, emb in enumerate((emb_x, emb_y)):
            for k in KERNEL_SIZES:
                col = im2col(emb, k)                           # (B, P, k*E)
                w = params[wkeys[k]][m, branch]                # (k*E, F)
                b = params[bkeys[k]][m, branch]                # (1, F)
                h = jnp.maximum(jnp.einsum("bpe,ef->bpf", col, w) + b, 0.0)
                feats.append(jnp.max(h, axis=1))
        feat = jnp.concatenate(feats, axis=-1)
        logits = logits + feat @ params["wfc"][m] + params["bfc"][m]
    return logits


# --------------------------------- main -----------------------------------
def make_params(key):
    ks = jax.random.split(key, 9)
    p = {}
    p["embed"] = 0.1 * jax.random.normal(ks[0], (VOCAB, EMBED), jnp.float32)
    for i, k in enumerate(KERNEL_SIZES):
        p[f"w{k}"] = 0.1 * jax.random.normal(
            ks[1 + i], (NUM_MODELS, 2, k * EMBED, FILTERS), jnp.float32)
        p[f"b{k}"] = 0.1 * jax.random.normal(
            ks[4 + i], (NUM_MODELS, 2, 1, FILTERS), jnp.float32)
    p["wfc"] = 0.1 * jax.random.normal(
        ks[7], (NUM_MODELS, FEAT_DIM, NUM_CLASSES), jnp.float32)
    p["bfc"] = 0.1 * jax.random.normal(
        ks[8], (NUM_MODELS, 1, NUM_CLASSES), jnp.float32)
    return p


if __name__ == "__main__":
    root = jax.random.PRNGKey(0)
    k_par, k_x, k_y = jax.random.split(root, 3)

    params = make_params(k_par)
    x_ids = jax.random.randint(k_x, (BATCH, LEN_X), 0, VOCAB, jnp.int32)
    y_ids = jax.random.randint(k_y, (BATCH, LEN_Y), 0, VOCAB, jnp.int32)

    out = boost_cnn10_char(x_ids, y_ids, params)
    out = jax.block_until_ready(out)

    ref = reference_forward(x_ids, y_ids, params)
    if not jnp.allclose(out, ref, atol=1e-4, rtol=1e-4):
        raise AssertionError(f"mismatch: max err {jnp.max(jnp.abs(out - ref))}")

    print("KERNEL_OK")
</pallas_src>

<mosaic_0001>
module attributes {stable_mosaic.version = 11 : i64} {
  func.func @_ensemble_kernel(%arg0: memref<22x32xf32, #tpu.memory_space<vmem>>, %arg1: memref<20x48xf32, #tpu.memory_space<vmem>>, %arg2: memref<18x64xf32, #tpu.memory_space<vmem>>, %arg3: memref<38x32xf32, #tpu.memory_space<vmem>>, %arg4: memref<36x48xf32, #tpu.memory_space<vmem>>, %arg5: memref<34x64xf32, #tpu.memory_space<vmem>>, %arg6: memref<32x80xf32, #tpu.memory_space<vmem>>, %arg7: memref<48x80xf32, #tpu.memory_space<vmem>>, %arg8: memref<64x80xf32, #tpu.memory_space<vmem>>, %arg9: memref<32x80xf32, #tpu.memory_space<vmem>>, %arg10: memref<48x80xf32, #tpu.memory_space<vmem>>, %arg11: memref<64x80xf32, #tpu.memory_space<vmem>>, %arg12: memref<6x1x80xf32, #tpu.memory_space<vmem>>, %arg13: memref<6x80x5xf32, #tpu.memory_space<vmem>>, %arg14: memref<1x5xf32, #tpu.memory_space<vmem>>, %arg15: memref<2x5xf32, #tpu.memory_space<vmem>>) attributes {dimension_semantics = [], scalar_prefetch = 0 : i64, scratch_operands = 0 : i64, tpu.core_type = #tpu.core_type<tc>} {
    %c0 = arith.constant 0 : index
    %c0_0 = arith.constant 0 : index
    %0 = vector.load %arg0[%c0, %c0_0] : memref<22x32xf32, #tpu.memory_space<vmem>>, vector<22x32xf32>
    %c0_1 = arith.constant 0 : index
    %c0_2 = arith.constant 0 : index
    %1 = vector.load %arg6[%c0_1, %c0_2] : memref<32x80xf32, #tpu.memory_space<vmem>>, vector<32x80xf32>
    %cst = arith.constant dense<0.000000e+00> : vector<22x80xf32>
    %2 = tpu.matmul %0, %1, %cst {dimension_numbers = #tpu.dot_dimension_numbers<[1], [0], [0], [1], [0, 0, 1, 1], [], []>} : vector<22x32xf32>, vector<32x80xf32>, vector<22x80xf32> -> vector<22x80xf32>
    %c0_3 = arith.constant 0 : index
    %c0_4 = arith.constant 0 : index
    %c0_5 = arith.constant 0 : index
    %3 = vector.load %arg12[%c0_3, %c0_4, %c0_5] : memref<6x1x80xf32, #tpu.memory_space<vmem>>, vector<1x1x80xf32>
    %4 = vector.shape_cast %3 : vector<1x1x80xf32> to vector<1x80xf32>
    %5 = vector.broadcast %4 : vector<1x80xf32> to vector<22x80xf32>
    %6 = arith.addf %2, %5 : vector<22x80xf32>
    %cst_6 = arith.constant 0.000000e+00 : f32
    %7 = vector.broadcast %cst_6 : f32 to vector<22x80xf32>
    %8 = arith.maximumf %6, %7 : vector<22x80xf32>
    %9 = vector.extract_strided_slice %8 {offsets = [0, 0], sizes = [11, 80], strides = [1, 1]} : vector<22x80xf32> to vector<11x80xf32>
    %cst_7 = arith.constant dense<0xFF800000> : vector<80xf32>
    %10 = vector.multi_reduction <maximumf>, %9, %cst_7 [0] : vector<11x80xf32> to vector<80xf32>
    %11 = vector.shape_cast %10 : vector<80xf32> to vector<1x80xf32>
    %12 = vector.extract_strided_slice %8 {offsets = [11, 0], sizes = [11, 80], strides = [1, 1]} : vector<22x80xf32> to vector<11x80xf32>
    %cst_8 = arith.constant dense<0xFF800000> : vector<80xf32>
    %13 = vector.multi_reduction <maximumf>, %12, %cst_8 [0] : vector<11x80xf32> to vector<80xf32>
    %14 = vector.shape_cast %13 : vector<80xf32> to vector<1x80xf32>
    %15 = tpu.concatenate %11, %14 in 0 : vector<1x80xf32>, vector<1x80xf32> -> vector<2x80xf32>
    %c0_9 = arith.constant 0 : index
    %c0_10 = arith.constant 0 : index
    %c0_11 = arith.constant 0 : index
    %16 = vector.load %arg13[%c0_9, %c0_10, %c0_11] : memref<6x80x5xf32, #tpu.memory_space<vmem>>, vector<1x80x5xf32>
    %17 = vector.shape_cast %16 : vector<1x80x5xf32> to vector<80x5xf32>
    %cst_12 = arith.constant dense<0.000000e+00> : vector<2x5xf32>
    %18 = tpu.matmul %15, %17, %cst_12 {dimension_numbers = #tpu.dot_dimension_numbers<[1], [0], [0], [1], [0, 0, 1, 1], [], []>} : vector<2x80xf32>, vector<80x5xf32>, vector<2x5xf32> -> vector<2x5xf32>
    %c0_13 = arith.constant 0 : index
    %c0_14 = arith.constant 0 : index
    %19 = vector.load %arg1[%c0_13, %c0_14] : memref<20x48xf32, #tpu.memory_space<vmem>>, vector<20x48xf32>
    %c0_15 = arith.constant 0 : index
    %c0_16 = arith.constant 0 : index
    %20 = vector.load %arg7[%c0_15, %c0_16] : memref<48x80xf32, #tpu.memory_space<vmem>>, vector<48x80xf32>
    %cst_17 = arith.constant dense<0.000000e+00> : vector<20x80xf32>
    %21 = tpu.matmul %19, %20, %cst_17 {dimension_numbers = #tpu.dot_dimension_numbers<[1], [0], [0], [1], [0, 0, 1, 1], [], []>} : vector<20x48xf32>, vector<48x80xf32>, vector<20x80xf32> -> vector<20x80xf32>
    %c1 = arith.constant 1 : index
    %c0_18 = arith.constant 0 : index
    %c0_19 = arith.constant 0 : index
    %22 = vector.load %arg12[%c1, %c0_18, %c0_19] : memref<6x1x80xf32, #tpu.memory_space<vmem>>, vector<1x1x80xf32>
    %23 = vector.shape_cast %22 : vector<1x1x80xf32> to vector<1x80xf32>
    %24 = vector.broadcast %23 : vector<1x80xf32> to vector<20x80xf32>
    %25 = arith.addf %21, %24 : vector<20x80xf32>
    %cst_20 = arith.constant 0.000000e+00 : f32
    %26 = vector.broadcast %cst_20 : f32 to vector<20x80xf32>
    %27 = arith.maximumf %25, %26 : vector<20x80xf32>
    %28 = vector.extract_strided_slice %27 {offsets = [0, 0], sizes = [10, 80], strides = [1, 1]} : vector<20x80xf32> to vector<10x80xf32>
    %cst_21 = arith.constant dense<0xFF800000> : vector<80xf32>
    %29 = vector.multi_reduction <maximumf>, %28, %cst_21 [0] : vector<10x80xf32> to vector<80xf32>
    %30 = vector.shape_cast %29 : vector<80xf32> to vector<1x80xf32>
    %31 = vector.extract_strided_slice %27 {offsets = [10, 0], sizes = [10, 80], strides = [1, 1]} : vector<20x80xf32> to vector<10x80xf32>
    %cst_22 = arith.constant dense<0xFF800000> : vector<80xf32>
    %32 = vector.multi_reduction <maximumf>, %31, %cst_22 [0] : vector<10x80xf32> to vector<80xf32>
    %33 = vector.shape_cast %32 : vector<80xf32> to vector<1x80xf32>
    %34 = tpu.concatenate %30, %33 in 0 : vector<1x80xf32>, vector<1x80xf32> -> vector<2x80xf32>
    %c1_23 = arith.constant 1 : index
    %c0_24 = arith.constant 0 : index
    %c0_25 = arith.constant 0 : index
    %35 = vector.load %arg13[%c1_23, %c0_24, %c0_25] : memref<6x80x5xf32, #tpu.memory_space<vmem>>, vector<1x80x5xf32>
    %36 = vector.shape_cast %35 : vector<1x80x5xf32> to vector<80x5xf32>
    %cst_26 = arith.constant dense<0.000000e+00> : vector<2x5xf32>
    %37 = tpu.matmul %34, %36, %cst_26 {dimension_numbers = #tpu.dot_dimension_numbers<[1], [0], [0], [1], [0, 0, 1, 1], [], []>} : vector<2x80xf32>, vector<80x5xf32>, vector<2x5xf32> -> vector<2x5xf32>
    %38 = arith.addf %18, %37 : vector<2x5xf32>
    %c0_27 = arith.constant 0 : index
    %c0_28 = arith.constant 0 : index
    %39 = vector.load %arg2[%c0_27, %c0_28] : memref<18x64xf32, #tpu.memory_space<vmem>>, vector<18x64xf32>
    %c0_29 = arith.constant 0 : index
    %c0_30 = arith.constant 0 : index
    %40 = vector.load %arg8[%c0_29, %c0_30] : memref<64x80xf32, #tpu.memory_space<vmem>>, vector<64x80xf32>
    %cst_31 = arith.constant dense<0.000000e+00> : vector<18x80xf32>
    %41 = tpu.matmul %39, %40, %cst_31 {dimension_numbers = #tpu.dot_dimension_numbers<[1], [0], [0], [1], [0, 0, 1, 1], [], []>} : vector<18x64xf32>, vector<64x80xf32>, vector<18x80xf32> -> vector<18x80xf32>
    %c2 = arith.constant 2 : index
    %c0_32 = arith.constant 0 : index
    %c0_33 = arith.constant 0 : index
    %42 = vector.load %arg12[%c2, %c0_32, %c0_33] : memref<6x1x80xf32, #tpu.memory_space<vmem>>, vector<1x1x80xf32>
    %43 = vector.shape_cast %42 : vector<1x1x80xf32> to vector<1x80xf32>
    %44 = vector.broadcast %43 : vector<1x80xf32> to vector<18x80xf32>
    %45 = arith.addf %41, %44 : vector<18x80xf32>
    %cst_34 = arith.constant 0.000000e+00 : f32
    %46 = vector.broadcast %cst_34 : f32 to vector<18x80xf32>
    %47 = arith.maximumf %45, %46 : vector<18x80xf32>
    %48 = vector.extract_strided_slice %47 {offsets = [0, 0], sizes = [9, 80], strides = [1, 1]} : vector<18x80xf32> to vector<9x80xf32>
    %cst_35 = arith.constant dense<0xFF800000> : vector<80xf32>
    %49 = vector.multi_reduction <maximumf>, %48, %cst_35 [0] : vector<9x80xf32> to vector<80xf32>
    %50 = vector.shape_cast %49 : vector<80xf32> to vector<1x80xf32>
    %51 = vector.extract_strided_slice %47 {offsets = [9, 0], sizes = [9, 80], strides = [1, 1]} : vector<18x80xf32> to vector<9x80xf32>
    %cst_36 = arith.constant dense<0xFF800000> : vector<80xf32>
    %52 = vector.multi_reduction <maximumf>, %51, %cst_36 [0] : vector<9x80xf32> to vector<80xf32>
    %53 = vector.shape_cast %52 : vector<80xf32> to vector<1x80xf32>
    %54 = tpu.concatenate %50, %53 in 0 : vector<1x80xf32>, vector<1x80xf32> -> vector<2x80xf32>
    %c2_37 = arith.constant 2 : index
    %c0_38 = arith.constant 0 : index
    %c0_39 = arith.constant 0 : index
    %55 = vector.load %arg13[%c2_37, %c0_38, %c0_39] : memref<6x80x5xf32, #tpu.memory_space<vmem>>, vector<1x80x5xf32>
    %56 = vector.shape_cast %55 : vector<1x80x5xf32> to vector<80x5xf32>
    %cst_40 = arith.constant dense<0.000000e+00> : vector<2x5xf32>
    %57 = tpu.matmul %54, %56, %cst_40 {dimension_numbers = #tpu.dot_dimension_numbers<[1], [0], [0], [1], [0, 0, 1, 1], [], []>} : vector<2x80xf32>, vector<80x5xf32>, vector<2x5xf32> -> vector<2x5xf32>
    %58 = arith.addf %38, %57 : vector<2x5xf32>
    %c0_41 = arith.constant 0 : index
    %c0_42 = arith.constant 0 : index
    %59 = vector.load %arg3[%c0_41, %c0_42] : memref<38x32xf32, #tpu.memory_space<vmem>>, vector<38x32xf32>
    %c0_43 = arith.constant 0 : index
    %c0_44 = arith.constant 0 : index
    %60 = vector.load %arg9[%c0_43, %c0_44] : memref<32x80xf32, #tpu.memory_space<vmem>>, vector<32x80xf32>
    %cst_45 = arith.constant dense<0.000000e+00> : vector<38x80xf32>
    %61 = tpu.matmul %59, %60, %cst_45 {dimension_numbers = #tpu.dot_dimension_numbers<[1], [0], [0], [1], [0, 0, 1, 1], [], []>} : vector<38x32xf32>, vector<32x80xf32>, vector<38x80xf32> -> vector<38x80xf32>
    %c3 = arith.constant 3 : index
    %c0_46 = arith.constant 0 : index
    %c0_47 = arith.constant 0 : index
    %62 = vector.load %arg12[%c3, %c0_46, %c0_47] : memref<6x1x80xf32, #tpu.memory_space<vmem>>, vector<1x1x80xf32>
    %63 = vector.shape_cast %62 : vector<1x1x80xf32> to vector<1x80xf32>
    %64 = vector.broadcast %63 : vector<1x80xf32> to vector<38x80xf32>
    %65 = arith.addf %61, %64 : vector<38x80xf32>
    %cst_48 = arith.constant 0.000000e+00 : f32
    %66 = vector.broadcast %cst_48 : f32 to vector<38x80xf32>
    %67 = arith.maximumf %65, %66 : vector<38x80xf32>
    %68 = vector.extract_strided_slice %67 {offsets = [0, 0], sizes = [19, 80], strides = [1, 1]} : vector<38x80xf32> to vector<19x80xf32>
    %cst_49 = arith.constant dense<0xFF800000> : vector<80xf32>
    %69 = vector.multi_reduction <maximumf>, %68, %cst_49 [0] : vector<19x80xf32> to vector<80xf32>
    %70 = vector.shape_cast %69 : vector<80xf32> to vector<1x80xf32>
    %71 = vector.extract_strided_slice %67 {offsets = [19, 0], sizes = [19, 80], strides = [1, 1]} : vector<38x80xf32> to vector<19x80xf32>
    %cst_50 = arith.constant dense<0xFF800000> : vector<80xf32>
    %72 = vector.multi_reduction <maximumf>, %71, %cst_50 [0] : vector<19x80xf32> to vector<80xf32>
    %73 = vector.shape_cast %72 : vector<80xf32> to vector<1x80xf32>
    %74 = tpu.concatenate %70, %73 in 0 : vector<1x80xf32>, vector<1x80xf32> -> vector<2x80xf32>
    %c3_51 = arith.constant 3 : index
    %c0_52 = arith.constant 0 : index
    %c0_53 = arith.constant 0 : index
    %75 = vector.load %arg13[%c3_51, %c0_52, %c0_53] : memref<6x80x5xf32, #tpu.memory_space<vmem>>, vector<1x80x5xf32>
    %76 = vector.shape_cast %75 : vector<1x80x5xf32> to vector<80x5xf32>
    %cst_54 = arith.constant dense<0.000000e+00> : vector<2x5xf32>
    %77 = tpu.matmul %74, %76, %cst_54 {dimension_numbers = #tpu.dot_dimension_numbers<[1], [0], [0], [1], [0, 0, 1, 1], [], []>} : vector<2x80xf32>, vector<80x5xf32>, vector<2x5xf32> -> vector<2x5xf32>
    %78 = arith.addf %58, %77 : vector<2x5xf32>
    %c0_55 = arith.constant 0 : index
    %c0_56 = arith.constant 0 : index
    %79 = vector.load %arg4[%c0_55, %c0_56] : memref<36x48xf32, #tpu.memory_space<vmem>>, vector<36x48xf32>
    %c0_57 = arith.constant 0 : index
    %c0_58 = arith.constant 0 : index
    %80 = vector.load %arg10[%c0_57, %c0_58] : memref<48x80xf32, #tpu.memory_space<vmem>>, vector<48x80xf32>
    %cst_59 = arith.constant dense<0.000000e+00> : vector<36x80xf32>
    %81 = tpu.matmul %79, %80, %cst_59 {dimension_numbers = #tpu.dot_dimension_numbers<[1], [0], [0], [1], [0, 0, 1, 1], [], []>} : vector<36x48xf32>, vector<48x80xf32>, vector<36x80xf32> -> vector<36x80xf32>
    %c4 = arith.constant 4 : index
    %c0_60 = arith.constant 0 : index
    %c0_61 = arith.constant 0 : index
    %82 = vector.load %arg12[%c4, %c0_60, %c0_61] : memref<6x1x80xf32, #tpu.memory_space<vmem>>, vector<1x1x80xf32>
    %83 = vector.shape_cast %82 : vector<1x1x80xf32> to vector<1x80xf32>
    %84 = vector.broadcast %83 : vector<1x80xf32> to vector<36x80xf32>
    %85 = arith.addf %81, %84 : vector<36x80xf32>
    %cst_62 = arith.constant 0.000000e+00 : f32
    %86 = vector.broadcast %cst_62 : f32 to vector<36x80xf32>
    %87 = arith.maximumf %85, %86 : vector<36x80xf32>
    %88 = vector.extract_strided_slice %87 {offsets = [0, 0], sizes = [18, 80], strides = [1, 1]} : vector<36x80xf32> to vector<18x80xf32>
    %cst_63 = arith.constant dense<0xFF800000> : vector<80xf32>
    %89 = vector.multi_reduction <maximumf>, %88, %cst_63 [0] : vector<18x80xf32> to vector<80xf32>
    %90 = vector.shape_cast %89 : vector<80xf32> to vector<1x80xf32>
    %91 = vector.extract_strided_slice %87 {offsets = [18, 0], sizes = [18, 80], strides = [1, 1]} : vector<36x80xf32> to vector<18x80xf32>
    %cst_64 = arith.constant dense<0xFF800000> : vector<80xf32>
    %92 = vector.multi_reduction <maximumf>, %91, %cst_64 [0] : vector<18x80xf32> to vector<80xf32>
    %93 = vector.shape_cast %92 : vector<80xf32> to vector<1x80xf32>
    %94 = tpu.concatenate %90, %93 in 0 : vector<1x80xf32>, vector<1x80xf32> -> vector<2x80xf32>
    %c4_65 = arith.constant 4 : index
    %c0_66 = arith.constant 0 : index
    %c0_67 = arith.constant 0 : index
    %95 = vector.load %arg13[%c4_65, %c0_66, %c0_67] : memref<6x80x5xf32, #tpu.memory_space<vmem>>, vector<1x80x5xf32>
    %96 = vector.shape_cast %95 : vector<1x80x5xf32> to vector<80x5xf32>
    %cst_68 = arith.constant dense<0.000000e+00> : vector<2x5xf32>
    %97 = tpu.matmul %94, %96, %cst_68 {dimension_numbers = #tpu.dot_dimension_numbers<[1], [0], [0], [1], [0, 0, 1, 1], [], []>} : vector<2x80xf32>, vector<80x5xf32>, vector<2x5xf32> -> vector<2x5xf32>
    %98 = arith.addf %78, %97 : vector<2x5xf32>
    %c0_69 = arith.constant 0 : index
    %c0_70 = arith.constant 0 : index
    %99 = vector.load %arg5[%c0_69, %c0_70] : memref<34x64xf32, #tpu.memory_space<vmem>>, vector<34x64xf32>
    %c0_71 = arith.constant 0 : index
    %c0_72 = arith.constant 0 : index
    %100 = vector.load %arg11[%c0_71, %c0_72] : memref<64x80xf32, #tpu.memory_space<vmem>>, vector<64x80xf32>
    %cst_73 = arith.constant dense<0.000000e+00> : vector<34x80xf32>
    %101 = tpu.matmul %99, %100, %cst_73 {dimension_numbers = #tpu.dot_dimension_numbers<[1], [0], [0], [1], [0, 0, 1, 1], [], []>} : vector<34x64xf32>, vector<64x80xf32>, vector<34x80xf32> -> vector<34x80xf32>
    %c5 = arith.constant 5 : index
    %c0_74 = arith.constant 0 : index
    %c0_75 = arith.constant 0 : index
    %102 = vector.load %arg12[%c5, %c0_74, %c0_75] : memref<6x1x80xf32, #tpu.memory_space<vmem>>, vector<1x1x80xf32>
    %103 = vector.shape_cast %102 : vector<1x1x80xf32> to vector<1x80xf32>
    %104 = vector.broadcast %103 : vector<1x80xf32> to vector<34x80xf32>
    %105 = arith.addf %101, %104 : vector<34x80xf32>
    %cst_76 = arith.constant 0.000000e+00 : f32
    %106 = vector.broadcast %cst_76 : f32 to vector<34x80xf32>
    %107 = arith.maximumf %105, %106 : vector<34x80xf32>
    %108 = vector.extract_strided_slice %107 {offsets = [0, 0], sizes = [17, 80], strides = [1, 1]} : vector<34x80xf32> to vector<17x80xf32>
    %cst_77 = arith.constant dense<0xFF800000> : vector<80xf32>
    %109 = vector.multi_reduction <maximumf>, %108, %cst_77 [0] : vector<17x80xf32> to vector<80xf32>
    %110 = vector.shape_cast %109 : vector<80xf32> to vector<1x80xf32>
    %111 = vector.extract_strided_slice %107 {offsets = [17, 0], sizes = [17, 80], strides = [1, 1]} : vector<34x80xf32> to vector<17x80xf32>
    %cst_78 = arith.constant dense<0xFF800000> : vector<80xf32>
    %112 = vector.multi_reduction <maximumf>, %111, %cst_78 [0] : vector<17x80xf32> to vector<80xf32>
    %113 = vector.shape_cast %112 : vector<80xf32> to vector<1x80xf32>
    %114 = tpu.concatenate %110, %113 in 0 : vector<1x80xf32>, vector<1x80xf32> -> vector<2x80xf32>
    %c5_79 = arith.constant 5 : index
    %c0_80 = arith.constant 0 : index
    %c0_81 = arith.constant 0 : index
    %115 = vector.load %arg13[%c5_79, %c0_80, %c0_81] : memref<6x80x5xf32, #tpu.memory_space<vmem>>, vector<1x80x5xf32>
    %116 = vector.shape_cast %115 : vector<1x80x5xf32> to vector<80x5xf32>
    %cst_82 = arith.constant dense<0.000000e+00> : vector<2x5xf32>
    %117 = tpu.matmul %114, %116, %cst_82 {dimension_numbers = #tpu.dot_dimension_numbers<[1], [0], [0], [1], [0, 0, 1, 1], [], []>} : vector<2x80xf32>, vector<80x5xf32>, vector<2x5xf32> -> vector<2x5xf32>
    %118 = arith.addf %98, %117 : vector<2x5xf32>
    %c0_83 = arith.constant 0 : index
    %c0_84 = arith.constant 0 : index
    %119 = vector.load %arg14[%c0_83, %c0_84] : memref<1x5xf32, #tpu.memory_space<vmem>>, vector<1x5xf32>
    %120 = vector.broadcast %119 : vector<1x5xf32> to vector<2x5xf32>
    %121 = arith.addf %118, %120 : vector<2x5xf32>
    %c0_85 = arith.constant 0 : index
    %c0_86 = arith.constant 0 : index
    %122 = vector.load %arg15[%c0_85, %c0_86] : memref<2x5xf32, #tpu.memory_space<vmem>>, vector<2x5xf32>
    tpu.vector_store %arg15[%c0_85, %c0_86], %121 {strides = array<i32>} : memref<2x5xf32, #tpu.memory_space<vmem>>, vector<2x5xf32>,
    return
  }
}

</mosaic_0001>

<bundles_post_ra>
// kernel: squeeze.18
= control target key start
LH: loop header
LB: loop body
LE: loop exit
PB: predicated region body
PF: predicated region fallthrough
CT: control target
= control target key end

     0   :  { %s83_s10 = smov 72   ;;  %s84_s11 = smov 56   ;;  %vm3_vm0 = vcmask 64512   ;;  %vm9_vm1 = vcmask 654912   ;;  %vm15_vm2 = vcmask 589312   ;;  %vm21_vm3 = vcmask 523712   ;;  %s135_s0 = inlined_call_operand.vmem [shape: f32[10,1,1,8], index: 0, kind: input, shape index: {}]   ;;  %s136_s1 = inlined_call_operand.vmem [shape: f32[1,1,80], index: 1, kind: output, shape index: {}]  }
   0x1   :  { %v65_v0 = vld [vmem:[%s135_s0 + $0x9] sm:$0x1]   ;;  %v67_v1 = vld [vmem:[%s135_s0 + $0x7] sm:$0x1]   ;;  %v69_v2 = vld [vmem:[%s135_s0 + $0x5] sm:$0x1]  }
   0x2   :  { %7 = vrot.lane.b32.xlu0 %v65_v0, %s83_s10  ;;  %19 = vrot.lane.b32.xlu1 %v67_v1, %s84_s11  ;;  %s85_s14 = smov 40   ;;  %v66_v3 = vld [vmem:[%s135_s0 + $0x8] sm:$0x1]   ;;  %v68_v4 = vld [vmem:[%s135_s0 + $0x6] sm:$0x1]   ;;  %s86_s19 = smov 64  }
   0x3   :  { %31 = vrot.lane.b32.xlu2 %v69_v2, %s85_s14  ;;  %s87_s20 = smov 48   ;;  %v70_v5 = vld [vmem:[%s135_s0 + $0x4] sm:$0x1]   ;;  %s88_s23 = smov 32   ;;  %v71_v6 = vld [vmem:[%s135_s0 + $0x3] sm:$0x1]  }
   0x4   :  { %v72_v7 = vld [vmem:[%s135_s0 + $0x2] sm:$0x1]   ;;  %s89_s28 = smov 24   ;;  %s90_s29 = smov 16   ;;  %v73_v8 = vld [vmem:[%s135_s0 + $0x1] sm:$0x1]  }
   0x5   :  { %s91_s3 = smov 8   ;;  %v2_v9 = vld [vmem:[%s135_s0] sm:$0x1]   ;;  %vm27_vm4 = vcmask 458112   ;;  %vm33_vm5 = vcmask 392512   ;;  %vm39_vm6 = vcmask 326912  }
   0x6   :  { %4 = vst.msk [vmem:[#allocation0] sm:$0x1] %vm3_vm0, %v2_v9   ;;  %vm45_vm7 = vcmask 261312   ;;  %vm51_vm8 = vcmask 195712   ;;  %vm57_vm9 = vcmask 130112  }
   0xa   :  { %13 = vrot.lane.b32.xlu0 %v66_v3, %s86_s19  ;;  %25 = vrot.lane.b32.xlu1 %v68_v4, %s87_s20 }
   0xb   :  { %37 = vrot.lane.b32.xlu2 %v70_v5, %s88_s23 }
  0x12   :  { %43 = vrot.lane.b32.xlu0 %v71_v6, %s89_s28  ;;  %49 = vrot.lane.b32.xlu1 %v72_v7, %s90_s29 }
  0x13   :  { %55 = vrot.lane.b32.xlu2 %v73_v8, %s91_s3 }
  0x5d   :  { %v32_v10 = vpop.permute.xlu2 %31  }
  0x65   :  { %v38_v11 = vpop.permute.xlu2 %37  }
  0x6d   :  { %v56_v12 = vpop.permute.xlu2 %55  }
  0x74   :  { %v8_v13 = vpop.permute.xlu0 %7   ;;  %v20_v14 = vpop.permute.xlu1 %19  }
  0x75   :  { %10 = vst.msk [vmem:[#allocation0] sm:$0x1] %vm9_vm1, %v8_v13  }
  0x7c   :  { %v14_v15 = vpop.permute.xlu0 %13   ;;  %v26_v16 = vpop.permute.xlu1 %25  }
  0x7d   :  { %16 = vst.msk [vmem:[#allocation0] sm:$0x1] %vm15_vm2, %v14_v15  }
  0x7e   :  { %22 = vst.msk [vmem:[#allocation0] sm:$0x1] %vm21_vm3, %v20_v14  }
  0x7f   :  { %28 = vst.msk [vmem:[#allocation0] sm:$0x1] %vm27_vm4, %v26_v16  }
  0x80   :  { %34 = vst.msk [vmem:[#allocation0] sm:$0x1] %vm33_vm5, %v32_v10  }
  0x81   :  { %40 = vst.msk [vmem:[#allocation0] sm:$0x1] %vm39_vm6, %v38_v11  }
  0x84   :  { %v44_v17 = vpop.permute.xlu0 %43   ;;  %v50_v18 = vpop.permute.xlu1 %49  }
  0x85   :  { %46 = vst.msk [vmem:[#allocation0] sm:$0x1] %vm45_vm7, %v44_v17  }
  0x86   :  { %52 = vst.msk [vmem:[#allocation0] sm:$0x1] %vm51_vm8, %v50_v18  }
  0x87   :  { %58 = vst.msk [vmem:[#allocation0] sm:$0x1] %vm57_vm9, %v56_v12  }
  0x8e   :  { %v61_v19 = vld [vmem:[#allocation0] sm:$0x1] }
  0x8f   :  { %64 = vst [vmem:[%s136_s1] sm:$0x1] %v61_v19 }

// kernel: boost_cnn10_char.1
= control target key start
LH: loop header
LB: loop body
LE: loop exit
PB: predicated region body
PF: predicated region fallthrough
CT: control target
= control target key end

     0   :  { %vm62_vm0 = vcmask 261120   ;;  %s1435_s0 = inlined_call_operand.vmem [shape: f32[22,32], index: 0, kind: input, shape index: {}]   ;;  %s1436_s1 = inlined_call_operand.vmem [shape: f32[20,48], index: 1, kind: input, shape index: {}]   ;;  %s1437_s2 = inlined_call_operand.vmem [shape: f32[18,64], index: 2, kind: input, shape index: {}]   ;;  %s1438_s3 = inlined_call_operand.vmem [shape: f32[38,32], index: 3, kind: input, shape index: {}]   ;;  %s1439_s4 = inlined_call_operand.vmem [shape: f32[36,48], index: 4, kind: input, shape index: {}]   ;;  %s1440_s5 = inlined_call_operand.vmem [shape: f32[34,64], index: 5, kind: input, shape index: {}]   ;;  %s1441_s6 = inlined_call_operand.vmem [shape: f32[32,80], index: 6, kind: input, shape index: {}]   ;;  %s1442_s7 = inlined_call_operand.vmem [shape: f32[48,80], index: 7, kind: input, shape index: {}]   ;;  %s1443_s8 = inlined_call_operand.vmem [shape: f32[64,80], index: 8, kind: input, shape index: {}]   ;;  %s1444_s9 = inlined_call_operand.vmem [shape: f32[32,80], index: 9, kind: input, shape index: {}]   ;;  %s1445_s10 = inlined_call_operand.vmem [shape: f32[48,80], index: 10, kind: input, shape index: {}]   ;;  %s1446_s11 = inlined_call_operand.vmem [shape: f32[64,80], index: 11, kind: input, shape index: {}]   ;;  %s1447_s12 = inlined_call_operand.vmem [shape: f32[6,1,80], index: 12, kind: input, shape index: {}]   ;;  %s1448_s13 = inlined_call_operand.vmem [shape: f32[6,80,5], index: 13, kind: input, shape index: {}]   ;;  %s1449_s14 = inlined_call_operand.vmem [shape: f32[1,5], index: 14, kind: input, shape index: {}]   ;;  %s1450_s15 = inlined_call_operand.hbm [shape: f32[2,5], index: 15, kind: output, shape index: {}]  }
   0x1   :  { %v57_v0 = vld [vmem:[%s1441_s6 + $0x18] sm:$0xff]  ;;  %v143_v1 = vld [vmem:[%s1442_s7 + $0x28] sm:$0xff]  ;;  %v56_v2 = vld [vmem:[%s1441_s6 + $0x10] sm:$0xff] }
   0x2   :  { %84 = vmatpush.msra.mxu0 %v57_v0  ;;  %169 = vmatpush.msra.mxu1 %v143_v1  ;;  %v142_v3 = vld [vmem:[%s1442_s7 + $0x20] sm:$0xff]  ;;  %v55_v4 = vld [vmem:[%s1441_s6 + $0x8] sm:$0xff]  ;;  %v141_v5 = vld [vmem:[%s1442_s7 + $0x18] sm:$0xff] }
   0x3   :  { %v54_v6 = vld [vmem:[%s1441_s6] sm:$0xff]  ;;  %v140_v7 = vld [vmem:[%s1442_s7 + $0x10] sm:$0xff]  ;;  %v139_v9 = vld [vmem:[%s1442_s7 + $0x8] sm:$0xff] }
   0x4   :  { %85 = vmatpush.msra.mxu0 %v56_v2  ;;  %170 = vmatpush.msra.mxu1 %v142_v3  ;;  %v51_v8 = vld [vmem:[%s1435_s0] sm:$0xff] }
   0x5   :  { %v138_v10 = vld [vmem:[%s1442_s7] sm:$0xff] }
   0x6   :  { %86 = vmatpush.msra.mxu0 %v55_v4  ;;  %171 = vmatpush.msra.mxu1 %v141_v5 }
   0x8   :  { %87 = vmatpush.msra.mxu0 %v54_v6  ;;  %172 = vmatpush.msra.mxu1 %v140_v7 }
   0x9   :  { %779 = vmatmul.msk.f32.vlgmr.msra.gmra.mxu0 %vm62_vm0, %v51_v8 }
   0xa   :  { %20 = vsyncpa [#allocation3], 0  ;;  %173 = vmatpush.msra.mxu1 %v139_v9  ;;  %v135_v11 = vld [vmem:[%s1436_s1] sm:$0xff]  ;;  %vm149_vm1 = vcmask 392192   ;;  %v52_v12 = vld [vmem:[%s1435_s0 + $0x8] sm:$0xff]  ;;  %vm101_vm2 = vcmask 654336  }
   0xb   :  { %v136_v13 = vld [vmem:[%s1436_s1 + $0x8] sm:$0xff]  ;;  %v53_v14 = vld [vmem:[%s1435_s0 + $0x10] sm:$0x3f]  ;;  %v133_v17 = vld [vmem:[%s1448_s13 + $0x40] sm:$0xff]  ;;  %vm103_vm3 = vcmask 649216   ;;  %vm189_vm4 = vcmask 648192  }
   0xc   :  { %174 = vmatpush.msra.mxu1 %v138_v10  ;;  %v137_v15 = vld [vmem:[%s1436_s1 + $0x10] sm:$0xf]  ;;  %v134_v16 = vld [vmem:[%s1448_s13 + $0x48] sm:$0xff]  ;;  %v132_v18 = vld [vmem:[%s1448_s13 + $0x38] sm:$0xff]  ;;  %vm112_vm5 = vcmask 654339   ;;  %vm114_vm6 = vcmask 652288  }
   0xd   :  { %783 = vmatmul.msk.f32.vlgmr.msra.gmra.mxu1 %vm149_vm1, %v135_v11  ;;  %253 = vmatpush.msrb.mxu0 %v134_v16  ;;  %v131_v19 = vld [vmem:[%s1448_s13 + $0x30] sm:$0xff]  ;;  %v130_v20 = vld [vmem:[%s1448_s13 + $0x28] sm:$0xff]  ;;  %v129_v21 = vld [vmem:[%s1448_s13 + $0x20] sm:$0xff]  ;;  %vm198_vm7 = vcmask 654338   ;;  %vm200_vm8 = vcmask 650240   ;;  %vm123_vm9 = vcmask 1040384  }
   0xe   :  { %v795_v22 = vld [vmem:[%s1448_s13 + $0x98] sm:$0xff]  ;;  %v794_v24 = vld [vmem:[%s1448_s13 + $0x90] sm:$0xff]  ;;  %v793_v26 = vld [vmem:[%s1448_s13 + $0x88] sm:$0xff]  ;;  %vm283_vm10 = vcmask 523264   ;;  %vm323_vm11 = vcmask 647168   ;;  %vm332_vm12 = vcmask 654337  }
   0xf   :  { %254 = vmatpush.msrb.mxu0 %v133_v17  ;;  %230 = vmatpush.msra.mxu2 %v795_v22  ;;  %v128_v23 = vld [vmem:[%s1448_s13 + $0x18] sm:$0xff]  ;;  %v127_v25 = vld [vmem:[%s1448_s13 + $0x10] sm:$0xff]  ;;  %v126_v27 = vld [vmem:[%s1448_s13 + $0x8] sm:$0xff]  ;;  %s898_s27 = smov [#allocation2]   ;;  %s770_s30 = sshll.u32 %s1450_s15, 4  ;;  %vm761_vm13 = vcmask 33792   ;;  %s771_s30 = int_to_ptr.hbm [resolvable:$true] %s770_s30 }
  0x10   :  { %v792_v28 = vld [vmem:[%s1448_s13 + $0x80] sm:$0xff]  ;;  %v791_v30 = vld [vmem:[%s1448_s13 + $0x78] sm:$0xff]  ;;  %v790_v33 = vld [vmem:[%s1448_s13 + $0x70] sm:$0xff]  ;;  %s768_s28 = sshll.u32 %s898_s27, 4  ;;  %s769_s28 = int_to_ptr.vmem [resolvable:$true] %s768_s28 }
  0x11   :  { %780 = vmatmul.msk.f32.gmra.mxu0 %vm62_vm0, %v52_v12  ;;  %231 = vmatpush.msra.mxu2 %v794_v24  ;;  %v125_v29 = vld [vmem:[%s1448_s13] sm:$0xff]  ;;  %v277_v31 = vld [vmem:[%s1443_s8 + $0x38] sm:$0xff]  ;;  %v276_v34 = vld [vmem:[%s1443_s8 + $0x30] sm:$0xff] }
  0x12   :  { %255 = vmatpush.msrb.mxu0 %v132_v18  ;;  %v865_v32 = vld [vmem:[%s1447_s12] ss:$0 sm:$0xff]  ;;  %v789_v36 = vld [vmem:[%s1448_s13 + $0x68] sm:$0xff]  ;;  %v866_v41 = vld [vmem:[%s1447_s12 + $0x1] ss:$0 sm:$0xff] }
  0x13   :  { %232 = vmatpush.msra.mxu2 %v793_v26  ;;  %v275_v37 = vld [vmem:[%s1443_s8 + $0x28] sm:$0xff]  ;;  %v788_v38 = vld [vmem:[%s1448_s13 + $0x60] sm:$0xff]  ;;  %v787_v43 = vld [vmem:[%s1448_s13 + $0x58] sm:$0xff] }
  0x14   :  { %256 = vmatpush.msrb.mxu0 %v131_v19  ;;  %v274_v39 = vld [vmem:[%s1443_s8 + $0x20] sm:$0xff]  ;;  %v273_v44 = vld [vmem:[%s1443_s8 + $0x18] sm:$0xff]  ;;  %v786_v45 = vld [vmem:[%s1448_s13 + $0x50] sm:$0xff] }
  0x15   :  { %784 = vmatmul.msk.f32.gmra.mxu1 %vm149_vm1, %v136_v13  ;;  %233 = vmatpush.msra.mxu2 %v792_v28  ;;  %v272_v46 = vld [vmem:[%s1443_s8 + $0x10] sm:$0xff]  ;;  %v386_v51 = vld [vmem:[%s1444_s9 + $0x18] sm:$0xff]  ;;  %v271_v52 = vld [vmem:[%s1443_s8 + $0x8] sm:$0xff] }
  0x16   :  { %257 = vmatpush.msrb.mxu0 %v130_v20  ;;  %v385_v53 = vld [vmem:[%s1444_s9 + $0x10] sm:$0xff]  ;;  %v270_v54 = vld [vmem:[%s1443_s8] sm:$0xff]  ;;  %v384_v61 = vld [vmem:[%s1444_s9 + $0x8] sm:$0xff] }
  0x17   :  { %234 = vmatpush.msra.mxu2 %v791_v30  ;;  %v383_v62 = vld [vmem:[%s1444_s9] sm:$0xff] }
  0x18   :  { %258 = vmatpush.msrb.mxu0 %v129_v21 }
  0x19   :  { %781 = vmatmul.msk.f32.gmra.mxu0 %vm62_vm0, %v53_v14  ;;  %235 = vmatpush.msra.mxu2 %v790_v33 }
  0x1a   :  { %259 = vmatpush.msrb.mxu0 %v128_v23 }
  0x1b   :  { %236 = vmatpush.msra.mxu2 %v789_v36 }
  0x1c   :  { %260 = vmatpush.msrb.mxu0 %v127_v25 }
  0x1d   :  { %785 = vmatmul.msk.f32.gmra.mxu1 %vm149_vm1, %v137_v15  ;;  %237 = vmatpush.msra.mxu2 %v788_v38 }
  0x1e   :  { %261 = vmatpush.msrb.mxu0 %v126_v27 }
  0x1f   :  { %238 = vmatpush.msra.mxu2 %v787_v43  ;;  %v378_v43 = vld [vmem:[%s1438_s3] sm:$0xff] }
  0x20   :  { %262 = vmatpush.msrb.mxu0 %v125_v29 }
  0x21   :  { %239 = vmatpush.msra.mxu2 %v786_v45  ;;  %v379_v45 = vld [vmem:[%s1438_s3 + $0x8] sm:$0xff] }
  0x22   :  { %301 = vmatpush.msra.mxu0 %v277_v31 }
  0x23   :  { %419 = vmatpush.msrb.mxu2 %v386_v51  ;;  %v810_v51 = vld [vmem:[%s1448_s13 + $0xe0] sm:$0xff] }
  0x24   :  { %302 = vmatpush.msra.mxu0 %v276_v34 }
  0x25   :  { %420 = vmatpush.msrb.mxu2 %v385_v53  ;;  %v808_v53 = vld [vmem:[%s1448_s13 + $0xd0] sm:$0xff] }
  0x26   :  { %303 = vmatpush.msra.mxu0 %v275_v37 }
  0x27   :  { %421 = vmatpush.msrb.mxu2 %v384_v61 }
  0x28   :  { %304 = vmatpush.msra.mxu0 %v274_v39 }
  0x29   :  { %422 = vmatpush.msrb.mxu2 %v383_v62  ;;  %v802_v62 = vld [vmem:[%s1448_s13 + $0xa0] sm:$0xff] }
  0x2a   :  { %305 = vmatpush.msra.mxu0 %v273_v44  ;;  %v268_v44 = vld [vmem:[%s1437_s2 + $0x8] sm:$0xff] }
  0x2c   :  { %306 = vmatpush.msra.mxu0 %v272_v46  ;;  %v269_v46 = vld [vmem:[%s1437_s2 + $0x10] sm:$0x3] }
  0x2e   :  { %307 = vmatpush.msra.mxu0 %v271_v52  ;;  %v809_v52 = vld [vmem:[%s1448_s13 + $0xd8] sm:$0xff] }
  0x30   :  { %308 = vmatpush.msra.mxu0 %v270_v54  ;;  %v807_v54 = vld [vmem:[%s1448_s13 + $0xc8] sm:$0xff] }
  0x86   :  { %v89_v35 = vpop.f32.mrf.mxu0 }
  0x87   :  { %v90_v40 = vadd.f32 %v865_v32, %v89_v35 }
  0x89   :  { %v98_v47 = vmax.f32 %v90_v40, 0.0 }
  0x8a   :  { %v176_v42 = vpop.f32.mrf.mxu1 }
  0x8b   :  { %v177_v49 = vadd.f32 %v866_v41, %v176_v42  ;;  %v102_v55 = vsel %vm101_vm2, %v98_v47, -inf  ;;  %v267_v42 = vld [vmem:[%s1437_s2] sm:$0xff]  ;;  %v380_v47 = vld [vmem:[%s1438_s3 + $0x10] sm:$0xff] }
  0x8d   :  { %v185_v58 = vmax.f32 %v177_v49, 0.0  ;;  %v382_v49 = vld [vmem:[%s1438_s3 + $0x20] sm:$0x3f] }
  0x8e   :  { %v92_v48 = vpop.f32.mrf.mxu0 }
  0x8f   :  { %v93_v50 = vadd.f32 %v865_v32, %v92_v48  ;;  %v188_v3 = vsel %vm101_vm2, %v185_v58, -inf  ;;  %v381_v48 = vld [vmem:[%s1438_s3 + $0x18] sm:$0xff]  ;;  %v804_v58 = vld [vmem:[%s1448_s13 + $0xb0] sm:$0xff] }
  0x91   :  { %v99_v56 = vmax.f32 %v93_v50, 0.0  ;;  %v811_v50 = vld [vmem:[%s1448_s13 + $0xe8] sm:$0xff] }
  0x92   :  { %v179_v57 = vpop.f32.mrf.mxu1  ;;  %363 = vmatpush.msrb.mxu1 %v811_v50 }
  0x93   :  { %v104_v59 = vsel %vm103_vm3, %v99_v56, -inf  ;;  %v180_v60 = vadd.f32 %v866_v41, %v179_v57  ;;  %v113_v8 = vsel %vm112_vm5, %v99_v56, -inf  ;;  %v806_v56 = vld [vmem:[%s1448_s13 + $0xc0] sm:$0xff]  ;;  %v805_v57 = vld [vmem:[%s1448_s13 + $0xb8] sm:$0xff] }
  0x94   :  { %v105_v63 = vmax.f32 %v102_v55, %v104_v59  ;;  %364 = vmatpush.msrb.mxu1 %v810_v51  ;;  %v803_v59 = vld [vmem:[%s1448_s13 + $0xa8] sm:$0xff] }
  0x95   :  { %v186_v0 = vmax.f32 %v180_v60, 0.0  ;;  %v867_v60 = vld [vmem:[%s1447_s12 + $0x2] ss:$0 sm:$0xff] }
  0x96   :  { %v106_v1 = vrot.slane %v105_v63, 4  ;;  %v95_v2 = vpop.f32.mrf.mxu0  ;;  %365 = vmatpush.msrb.mxu1 %v809_v52  ;;  %v637_v52 = vld [vmem:[%s1446_s11 + $0x20] sm:$0xff] }
  0x97   :  { %v190_v4 = vsel %vm189_vm4, %v186_v0, -inf  ;;  %v96_v5 = vadd.f32 %v865_v32, %v95_v2  ;;  %v199_v20 = vsel %vm198_vm7, %v186_v0, -inf }
  0x98   :  { %v107_v6 = vmax.f32 %v105_v63, %v106_v1  ;;  %v191_v7 = vmax.f32 %v188_v3, %v190_v4  ;;  %366 = vmatpush.msrb.mxu1 %v808_v53  ;;  %v512_v63 = vld [vmem:[%s1445_s10 + $0x28] sm:$0xff]  ;;  %v511_v3 = vld [vmem:[%s1445_s10 + $0x20] sm:$0xff]  ;;  %v828_v4 = vld [vmem:[%s1448_s13 + $0x138] sm:$0xff] }
  0x99   :  { %v100_v9 = vmax.f32 %v96_v5, 0.0  ;;  %487 = vmatpush.msra.mxu3 %v828_v4  ;;  %v510_v5 = vld [vmem:[%s1445_s10 + $0x18] sm:$0xff] }
  0x9a   :  { %v108_v10 = vrot.slane %v107_v6, 2  ;;  %v192_v11 = vrot.slane %v191_v7, 4  ;;  %v182_v12 = vpop.f32.mrf.mxu1  ;;  %367 = vmatpush.msrb.mxu1 %v807_v54 }
  0x9b   :  { %v115_v13 = vsel %vm114_vm6, %v100_v9, -inf  ;;  %v183_v14 = vadd.f32 %v866_v41, %v182_v12  ;;  %v508_v12 = vld [vmem:[%s1445_s10 + $0x8] sm:$0xff] }
  0x9c   :  { %v193_v15 = vmax.f32 %v191_v7, %v192_v11  ;;  %v116_v16 = vmax.f32 %v113_v8, %v115_v13  ;;  %v109_v18 = vmax.f32 %v107_v6, %v108_v10  ;;  %368 = vmatpush.msrb.mxu1 %v806_v56  ;;  %v827_v6 = vld [vmem:[%s1448_s13 + $0x130] sm:$0xff]  ;;  %v826_v10 = vld [vmem:[%s1448_s13 + $0x128] sm:$0xff] }
  0x9d   :  { %v187_v17 = vmax.f32 %v183_v14, 0.0  ;;  %488 = vmatpush.msra.mxu3 %v827_v6  ;;  %v509_v8 = vld [vmem:[%s1445_s10 + $0x10] sm:$0xff]  ;;  %v825_v14 = vld [vmem:[%s1448_s13 + $0x120] sm:$0xff] }
  0x9e   :  { %v117_v19 = vrot.slane %v116_v16, 4  ;;  %v194_v22 = vrot.slane %v193_v15, 2  ;;  %v110_v27 = vrot.slane %v109_v18, 1  ;;  %369 = vmatpush.msrb.mxu1 %v805_v57  ;;  %v635_v56 = vld [vmem:[%s1446_s11 + $0x10] sm:$0xff] }
  0x9f   :  { %v201_v21 = vsel %vm200_vm8, %v187_v17, -inf  ;;  %489 = vmatpush.msra.mxu3 %v826_v10  ;;  %v507_v17 = vld [vmem:[%s1445_s10] sm:$0xff] }
  0xa0   :  { %v118_v23 = vmax.f32 %v116_v16, %v117_v19  ;;  %v202_v24 = vmax.f32 %v199_v20, %v201_v21  ;;  %v195_v28 = vmax.f32 %v193_v15, %v194_v22  ;;  %v111_v32 = vmax.f32 %v109_v18, %v110_v27  ;;  %370 = vmatpush.msrb.mxu1 %v804_v58  ;;  %v824_v18 = vld [vmem:[%s1448_s13 + $0x118] sm:$0xff]  ;;  %v823_v21 = vld [vmem:[%s1448_s13 + $0x110] sm:$0xff] }
  0xa1   :  { %490 = vmatpush.msra.mxu3 %v825_v14 }
  0xa2   :  { %v119_v25 = vrot.slane %v118_v23, 2  ;;  %v203_v26 = vrot.slane %v202_v24, 4  ;;  %v196_v36 = vrot.slane %v195_v28, 1  ;;  %371 = vmatpush.msrb.mxu1 %v803_v59 }
  0xa3   :  { %491 = vmatpush.msra.mxu3 %v824_v18 }
  0xa4   :  { %v120_v29 = vmax.f32 %v118_v23, %v119_v25  ;;  %v204_v30 = vmax.f32 %v202_v24, %v203_v26  ;;  %v197_v39 = vmax.f32 %v195_v28, %v196_v36  ;;  %372 = vmatpush.msrb.mxu1 %v802_v62  ;;  %v822_v24 = vld [vmem:[%s1448_s13 + $0x108] sm:$0xff]  ;;  %v821_v28 = vld [vmem:[%s1448_s13 + $0x100] sm:$0xff]  ;;  %v819_v36 = vld [vmem:[%s1448_s13 + $0xf0] sm:$0xff] }
  0xa5   :  { %492 = vmatpush.msra.mxu3 %v823_v21 }
  0xa6   :  { %v205_v31 = vrot.slane %v204_v30, 2  ;;  %v121_v33 = vrot.slane %v120_v29, 1  ;;  %543 = vmatpush.msra.mxu1 %v512_v63 }
  0xa7   :  { %493 = vmatpush.msra.mxu3 %v822_v24 }
  0xa8   :  { %v206_v34 = vmax.f32 %v204_v30, %v205_v31  ;;  %v122_v35 = vmax.f32 %v120_v29, %v121_v33  ;;  %544 = vmatpush.msra.mxu1 %v511_v3  ;;  %v868_v33 = vld [vmem:[%s1447_s12 + $0x3] ss:$0 sm:$0xff] }
  0xa9   :  { %494 = vmatpush.msra.mxu3 %v821_v28 }
  0xaa   :  { %v124_v37 = vsel %vm123_vm9, %v111_v32, %v122_v35  ;;  %v207_v38 = vrot.slane %v206_v34, 1  ;;  %545 = vmatpush.msra.mxu1 %v510_v5  ;;  %v820_v32 = vld [vmem:[%s1448_s13 + $0xf8] sm:$0xff]  ;;  %v633_v5 = vld [vmem:[%s1446_s11] sm:$0xff] }
  0xab   :  { %797 = vmatmul.msk.f32.vlgmr.msrb.gmra.mxu0 %vm101_vm2, %v124_v37  ;;  %495 = vmatpush.msra.mxu3 %v820_v32  ;;  %v628_v32 = vld [vmem:[%s1440_s5] sm:$0xff] }
  0xac   :  { %v208_v40 = vmax.f32 %v206_v34, %v207_v38  ;;  %546 = vmatpush.msra.mxu1 %v509_v8  ;;  %v640_v38 = vld [vmem:[%s1446_s11 + $0x38] sm:$0xff] }
  0xad   :  { %496 = vmatpush.msra.mxu3 %v819_v36  ;;  %v631_v36 = vld [vmem:[%s1440_s5 + $0x18] sm:$0xff] }
  0xae   :  { %v209_v41 = vsel %vm123_vm9, %v197_v39, %v208_v40  ;;  %547 = vmatpush.msra.mxu1 %v508_v12 }
  0xaf   :  { %796 = vmatmul.msk.f32.vlgmr.msra.gmra.mxu2 %vm101_vm2, %v209_v41  ;;  %669 = vmatpush.msrb.mxu3 %v640_v38  ;;  %v639_v41 = vld [vmem:[%s1446_s11 + $0x30] sm:$0xff] }
  0xb0   :  { %548 = vmatpush.msra.mxu1 %v507_v17 }
  0xb1   :  { %670 = vmatpush.msrb.mxu3 %v639_v41  ;;  %v845_v41 = vld [vmem:[%s1448_s13 + $0x188] sm:$0xff] }
  0xb2   :  { %613 = vmatpush.msrb.mxu0 %v845_v41  ;;  %v854_v41 = vld [vmem:[%s1448_s13 + $0x198] sm:$0xff] }
  0xb3   :  { %799 = vmatmul.msk.f32.vlgmr.msra.gmra.mxu0 %vm283_vm10, %v267_v42 }
  0xb7   :  { %814 = vmatmul.msk.f32.vlgmr.msrb.gmra.mxu2 %vm62_vm0, %v378_v43  ;;  %v638_v43 = vld [vmem:[%s1446_s11 + $0x28] sm:$0xff] }
  0xb8   :  { %671 = vmatpush.msrb.mxu3 %v638_v43  ;;  %v869_v43 = vld [vmem:[%s1447_s12 + $0x4] ss:$0 sm:$0xff] }
  0xba   :  { %672 = vmatpush.msrb.mxu3 %v637_v52  ;;  %v839_v52 = vld [vmem:[%s1448_s13 + $0x158] sm:$0xff] }
  0xbb   :  { %800 = vmatmul.msk.f32.gmra.mxu0 %vm283_vm10, %v268_v44 }
  0xbf   :  { %815 = vmatmul.msk.f32.gmra.mxu2 %vm62_vm0, %v379_v45 }
  0xc3   :  { %801 = vmatmul.msk.f32.gmra.mxu0 %vm283_vm10, %v269_v46 }
  0xc7   :  { %816 = vmatmul.msk.f32.gmra.mxu2 %vm62_vm0, %v380_v47 }
  0xcf   :  { %817 = vmatmul.msk.f32.gmra.mxu2 %vm62_vm0, %v381_v48 }
  0xd7   :  { %818 = vmatmul.msk.f32.gmra.mxu2 %vm62_vm0, %v382_v49 }
 0x128   :  { %v264_v55 = vpop.f32.mrf.mxu0 }
 0x130   :  { %v310_v61 = vpop.f32.mrf.mxu0 }
 0x131   :  { %v311_v1 = vadd.f32 %v867_v60, %v310_v61  ;;  %v634_v61 = vld [vmem:[%s1446_s11 + $0x8] sm:$0xff] }
 0x132   :  { %v241_v0 = vpop.f32.mrf.mxu2 }
 0x133   :  { %v1215_v2 = vadd.f32 %v264_v55, %v241_v0  ;;  %v319_v7 = vmax.f32 %v311_v1, 0.0  ;;  %v636_v55 = vld [vmem:[%s1446_s11 + $0x18] sm:$0xff] }
 0x134   :  { %673 = vmatpush.msrb.mxu3 %v636_v55 }
 0x135   :  { %v322_v15 = vsel %vm101_vm2, %v319_v7, -inf }
 0x136   :  { %674 = vmatpush.msrb.mxu3 %v635_v56 }
 0x138   :  { %v313_v9 = vpop.f32.mrf.mxu0  ;;  %675 = vmatpush.msrb.mxu3 %v634_v61  ;;  %v836_v61 = vld [vmem:[%s1448_s13 + $0x140] sm:$0xff] }
 0x139   :  { %v314_v11 = vadd.f32 %v867_v60, %v313_v9  ;;  %v502_v9 = vld [vmem:[%s1439_s4] sm:$0xff] }
 0x13a   :  { %v424_v13 = vpop.f32.mrf.mxu2  ;;  %676 = vmatpush.msrb.mxu3 %v633_v5 }
 0x13b   :  { %v320_v16 = vmax.f32 %v314_v11, 0.0  ;;  %v425_v42 = vadd.f32 %v868_v33, %v424_v13 }
 0x13d   :  { %v324_v19 = vsel %vm323_vm11, %v320_v16, -inf  ;;  %v333_v29 = vsel %vm332_vm12, %v320_v16, -inf  ;;  %v439_v50 = vmax.f32 %v425_v42, 0.0  ;;  %v844_v42 = vld [vmem:[%s1448_s13 + $0x180] sm:$0xff] }
 0x13e   :  { %v325_v20 = vmax.f32 %v322_v15, %v324_v19  ;;  %614 = vmatpush.msrb.mxu0 %v844_v42 }
 0x13f   :  { %v444_v59 = vsel %vm101_vm2, %v439_v50, -inf }
 0x140   :  { %v326_v22 = vrot.slane %v325_v20, 4  ;;  %v316_v23 = vpop.f32.mrf.mxu0 }
 0x141   :  { %v317_v25 = vadd.f32 %v867_v60, %v316_v23 }
 0x142   :  { %v327_v26 = vmax.f32 %v325_v20, %v326_v22  ;;  %v427_v27 = vpop.f32.mrf.mxu2  ;;  %v503_v20 = vld [vmem:[%s1439_s4 + $0x8] sm:$0xff] }
 0x143   :  { %v321_v30 = vmax.f32 %v317_v25, 0.0  ;;  %v428_v37 = vadd.f32 %v868_v33, %v427_v27 }
 0x144   :  { %v328_v31 = vrot.slane %v327_v26, 2 }
 0x145   :  { %v334_v34 = vsel %vm189_vm4, %v321_v30, -inf  ;;  %v440_v46 = vmax.f32 %v428_v37, 0.0  ;;  %v632_v37 = vld [vmem:[%s1440_s5 + $0x20] sm:$0x3] }
 0x146   :  { %v335_v35 = vmax.f32 %v333_v29, %v334_v34  ;;  %v329_v39 = vmax.f32 %v327_v26, %v328_v31  ;;  %v504_v26 = vld [vmem:[%s1439_s4 + $0x10] sm:$0xff]  ;;  %v505_v31 = vld [vmem:[%s1439_s4 + $0x18] sm:$0xff]  ;;  %v629_v34 = vld [vmem:[%s1440_s5 + $0x8] sm:$0xff] }
 0x147   :  { %v445_v54 = vsel %vm101_vm2, %v440_v46, -inf }
 0x148   :  { %v336_v40 = vrot.slane %v335_v35, 4  ;;  %v330_v49 = vrot.slane %v329_v39, 1  ;;  %v447_v62 = vmax.f32 %v444_v59, %v445_v54  ;;  %v862_v59 = vld [vmem:[%s1448_s13 + $0x1d8] sm:$0xff] }
 0x149   :  { %741 = vmatpush.msra.mxu2 %v862_v59 }
 0x14a   :  { %v337_v44 = vmax.f32 %v335_v35, %v336_v40  ;;  %v430_v45 = vpop.f32.mrf.mxu2  ;;  %v331_v57 = vmax.f32 %v329_v39, %v330_v49  ;;  %v630_v35 = vld [vmem:[%s1440_s5 + $0x10] sm:$0xff]  ;;  %v840_v49 = vld [vmem:[%s1448_s13 + $0x160] sm:$0xff] }
 0x14b   :  { %v431_v47 = vadd.f32 %v868_v33, %v430_v45 }
 0x14c   :  { %v338_v48 = vrot.slane %v337_v44, 2 }
 0x14d   :  { %v441_v51 = vmax.f32 %v431_v47, 0.0 }
 0x14e   :  { %v339_v53 = vmax.f32 %v337_v44, %v338_v48  ;;  %v843_v44 = vld [vmem:[%s1448_s13 + $0x178] sm:$0xff]  ;;  %v841_v48 = vld [vmem:[%s1448_s13 + $0x168] sm:$0xff] }
 0x14f   :  { %v446_v60 = vsel %vm103_vm3, %v441_v51, -inf  ;;  %v455_v13 = vsel %vm112_vm5, %v441_v51, -inf  ;;  %615 = vmatpush.msrb.mxu0 %v843_v44 }
 0x150   :  { %v340_v58 = vrot.slane %v339_v53, 1  ;;  %v448_v3 = vmax.f32 %v447_v62, %v446_v60 }
 0x152   :  { %v433_v63 = vpop.f32.mrf.mxu2  ;;  %v341_v0 = vmax.f32 %v339_v53, %v340_v58  ;;  %v449_v7 = vrot.slane %v448_v3, 4  ;;  %v838_v53 = vld [vmem:[%s1448_s13 + $0x150] sm:$0xff]  ;;  %v837_v58 = vld [vmem:[%s1448_s13 + $0x148] sm:$0xff] }
 0x153   :  { %v434_v1 = vadd.f32 %v868_v33, %v433_v63 }
 0x154   :  { %v342_v4 = vsel %vm123_vm9, %v331_v57, %v341_v0  ;;  %v450_v12 = vmax.f32 %v448_v3, %v449_v7 }
 0x155   :  { %812 = vmatmul.msk.f32.vlgmr.msrb.gmra.mxu1 %vm101_vm2, %v342_v4  ;;  %v442_v6 = vmax.f32 %v434_v1, 0.0 }
 0x156   :  { %v451_v17 = vrot.slane %v450_v12, 2 }
 0x157   :  { %v456_v10 = vsel %vm101_vm2, %v442_v6, -inf }
 0x158   :  { %v458_v15 = vmax.f32 %v455_v13, %v456_v10  ;;  %v452_v21 = vmax.f32 %v450_v12, %v451_v17 }
 0x15a   :  { %v436_v8 = vpop.f32.mrf.mxu2  ;;  %v453_v25 = vrot.slane %v452_v21, 1 }
 0x15b   :  { %v437_v11 = vadd.f32 %v868_v33, %v436_v8  ;;  %v506_v33 = vld [vmem:[%s1439_s4 + $0x20] sm:$0xf] }
 0x15c   :  { %v454_v28 = vmax.f32 %v452_v21, %v453_v25 }
 0x15d   :  { %v443_v14 = vmax.f32 %v437_v11, 0.0  ;;  %831 = vmatmul.msk.f32.vlgmr.msra.gmra.mxu1 %vm149_vm1, %v502_v9 }
 0x15f   :  { %v457_v16 = vsel %vm114_vm6, %v443_v14, -inf }
 0x160   :  { %v459_v18 = vmax.f32 %v458_v15, %v457_v16  ;;  %v861_v15 = vld [vmem:[%s1448_s13 + $0x1d0] sm:$0xff]  ;;  %v860_v16 = vld [vmem:[%s1448_s13 + $0x1c8] sm:$0xff] }
 0x161   :  { %742 = vmatpush.msra.mxu2 %v861_v15  ;;  %v871_v15 = vld [vmem:[%s1449_s14] ss:$0 sm:$0xff] }
 0x162   :  { %v460_v19 = vrot.slane %v459_v18, 4 }
 0x163   :  { %743 = vmatpush.msra.mxu2 %v860_v16 }
 0x164   :  { %v461_v22 = vmax.f32 %v459_v18, %v460_v19  ;;  %v859_v19 = vld [vmem:[%s1448_s13 + $0x1c0] sm:$0xff] }
 0x165   :  { %832 = vmatmul.msk.f32.gmra.mxu1 %vm149_vm1, %v503_v20  ;;  %744 = vmatpush.msra.mxu2 %v859_v19 }
 0x166   :  { %v462_v23 = vrot.slane %v461_v22, 2 }
 0x168   :  { %v463_v24 = vmax.f32 %v461_v22, %v462_v23  ;;  %v858_v22 = vld [vmem:[%s1448_s13 + $0x1b8] sm:$0xff] }
 0x169   :  { %745 = vmatpush.msra.mxu2 %v858_v22 }
 0x16a   :  { %v464_v27 = vrot.slane %v463_v24, 1 }
 0x16c   :  { %v465_v29 = vmax.f32 %v463_v24, %v464_v27  ;;  %v870_v27 = vld [vmem:[%s1447_s12 + $0x5] ss:$0 sm:$0xff] }
 0x16d   :  { %833 = vmatmul.msk.f32.gmra.mxu1 %vm149_vm1, %v504_v26 }
 0x16e   :  { %v466_v30 = vsel %vm123_vm9, %v454_v28, %v465_v29  ;;  %v857_v28 = vld [vmem:[%s1448_s13 + $0x1b0] sm:$0xff] }
 0x16f   :  { %829 = vmatmul.msk.f32.vlgmr.msra.gmra.mxu3 %vm101_vm2, %v466_v30  ;;  %746 = vmatpush.msra.mxu2 %v857_v28 }
 0x175   :  { %834 = vmatmul.msk.f32.gmra.mxu1 %vm149_vm1, %v505_v31 }
 0x177   :  { %848 = vmatmul.msk.f32.vlgmr.msrb.gmra.mxu3 %vm283_vm10, %v628_v32  ;;  %v856_v32 = vld [vmem:[%s1448_s13 + $0x1a8] sm:$0xff] }
 0x178   :  { %747 = vmatpush.msra.mxu2 %v856_v32 }
 0x17d   :  { %835 = vmatmul.msk.f32.gmra.mxu1 %vm149_vm1, %v506_v33 }
 0x17f   :  { %849 = vmatmul.msk.f32.gmra.mxu3 %vm283_vm10, %v629_v34 }
 0x187   :  { %850 = vmatmul.msk.f32.gmra.mxu3 %vm283_vm10, %v630_v35  ;;  %v855_v35 = vld [vmem:[%s1448_s13 + $0x1a0] sm:$0xff] }
 0x188   :  { %748 = vmatpush.msra.mxu2 %v855_v35 }
 0x18a   :  { %749 = vmatpush.msra.mxu2 %v854_v41 }
 0x18f   :  { %851 = vmatmul.msk.f32.gmra.mxu3 %vm283_vm10, %v631_v36 }
 0x197   :  { %852 = vmatmul.msk.f32.gmra.mxu3 %vm283_vm10, %v632_v37 }
 0x1d2   :  { %v374_v38 = vpop.f32.mrf.mxu1 }
 0x1d3   :  { %v377_v39 = vadd.f32 %v374_v38, %v1215_v2  ;;  %v842_v2 = vld [vmem:[%s1448_s13 + $0x170] sm:$0xff] }
 0x1d4   :  { %616 = vmatpush.msrb.mxu0 %v842_v2 }
 0x1d6   :  { %617 = vmatpush.msrb.mxu0 %v841_v48 }
 0x1d8   :  { %618 = vmatpush.msrb.mxu0 %v840_v49 }
 0x1da   :  { %v550_v40 = vpop.f32.mrf.mxu1  ;;  %619 = vmatpush.msrb.mxu0 %v839_v52 }
 0x1db   :  { %v551_v46 = vadd.f32 %v869_v43, %v550_v40 }
 0x1dc   :  { %620 = vmatpush.msrb.mxu0 %v838_v53 }
 0x1dd   :  { %v565_v50 = vmax.f32 %v551_v46, 0.0 }
 0x1de   :  { %621 = vmatpush.msrb.mxu0 %v837_v58 }
 0x1df   :  { %v570_v55 = vsel %vm101_vm2, %v565_v50, -inf }
 0x1e0   :  { %622 = vmatpush.msrb.mxu0 %v836_v61 }
 0x1e2   :  { %v553_v45 = vpop.f32.mrf.mxu1 }
 0x1e3   :  { %v554_v47 = vadd.f32 %v869_v43, %v553_v45 }
 0x1e5   :  { %v566_v51 = vmax.f32 %v554_v47, 0.0 }
 0x1e7   :  { %v571_v56 = vsel %vm101_vm2, %v566_v51, -inf }
 0x1e8   :  { %v573_v62 = vmax.f32 %v570_v55, %v571_v56 }
 0x1ea   :  { %v556_v54 = vpop.f32.mrf.mxu1 }
 0x1eb   :  { %v557_v57 = vadd.f32 %v869_v43, %v556_v54 }
 0x1ed   :  { %v567_v60 = vmax.f32 %v557_v57, 0.0 }
 0x1ef   :  { %v572_v63 = vsel %vm189_vm4, %v567_v60, -inf  ;;  %v581_v8 = vsel %vm198_vm7, %v567_v60, -inf }
 0x1f0   :  { %v574_v0 = vmax.f32 %v573_v62, %v572_v63 }
 0x1f2   :  { %v498_v1 = vpop.f32.mrf.mxu3  ;;  %v559_v3 = vpop.f32.mrf.mxu1  ;;  %v575_v7 = vrot.slane %v574_v0, 4 }
 0x1f3   :  { %v1383_v4 = vadd.f32 %v498_v1, %v377_v39  ;;  %v560_v5 = vadd.f32 %v869_v43, %v559_v3 }
 0x1f4   :  { %v576_v10 = vmax.f32 %v574_v0, %v575_v7 }
 0x1f5   :  { %v568_v6 = vmax.f32 %v560_v5, 0.0 }
 0x1f6   :  { %v577_v18 = vrot.slane %v576_v10, 2 }
 0x1f7   :  { %v582_v9 = vsel %vm101_vm2, %v568_v6, -inf }
 0x1f8   :  { %v584_v14 = vmax.f32 %v581_v8, %v582_v9  ;;  %v578_v23 = vmax.f32 %v576_v10, %v577_v18 }
 0x1fa   :  { %v562_v11 = vpop.f32.mrf.mxu1  ;;  %v678_v12 = vpop.f32.mrf.mxu3  ;;  %v579_v29 = vrot.slane %v578_v23, 1 }
 0x1fb   :  { %v563_v13 = vadd.f32 %v869_v43, %v562_v11  ;;  %v679_v34 = vadd.f32 %v870_v27, %v678_v12  ;;  %v853_v43 = vld [vmem:[%s1448_s13 + $0x190] sm:$0xff] }
 0x1fc   :  { %v580_v36 = vmax.f32 %v578_v23, %v579_v29  ;;  %750 = vmatpush.msra.mxu2 %v853_v43 }
 0x1fd   :  { %v569_v17 = vmax.f32 %v563_v13, 0.0  ;;  %v693_v44 = vmax.f32 %v679_v34, 0.0 }
 0x1ff   :  { %v583_v20 = vsel %vm200_vm8, %v569_v17, -inf  ;;  %v698_v47 = vsel %vm101_vm2, %v693_v44, -inf }
 0x200   :  { %v585_v21 = vmax.f32 %v584_v14, %v583_v20 }
 0x202   :  { %v586_v24 = vrot.slane %v585_v21, 4  ;;  %v681_v25 = vpop.f32.mrf.mxu3 }
 0x203   :  { %v682_v31 = vadd.f32 %v870_v27, %v681_v25 }
 0x204   :  { %v587_v26 = vmax.f32 %v585_v21, %v586_v24 }
 0x205   :  { %v694_v39 = vmax.f32 %v682_v31, 0.0 }
 0x206   :  { %v588_v30 = vrot.slane %v587_v26, 2 }
 0x207   :  { %v699_v46 = vsel %vm101_vm2, %v694_v39, -inf }
 0x208   :  { %v589_v33 = vmax.f32 %v587_v26, %v588_v30  ;;  %v701_v49 = vmax.f32 %v698_v47, %v699_v46 }
 0x20a   :  { %v590_v37 = vrot.slane %v589_v33, 1  ;;  %v684_v38 = vpop.f32.mrf.mxu3 }
 0x20b   :  { %v685_v40 = vadd.f32 %v870_v27, %v684_v38 }
 0x20c   :  { %v591_v42 = vmax.f32 %v589_v33, %v590_v37 }
 0x20d   :  { %v695_v2 = vmax.f32 %v685_v40, 0.0 }
 0x20e   :  { %v592_v45 = vsel %vm123_vm9, %v580_v36, %v591_v42 }
 0x20f   :  { %846 = vmatmul.msk.f32.vlgmr.msrb.gmra.mxu0 %vm101_vm2, %v592_v45  ;;  %v700_v48 = vsel %vm323_vm11, %v695_v2, -inf  ;;  %v709_v59 = vsel %vm332_vm12, %v695_v2, -inf }
 0x210   :  { %v702_v52 = vmax.f32 %v701_v49, %v700_v48 }
 0x212   :  { %v687_v50 = vpop.f32.mrf.mxu3  ;;  %v703_v54 = vrot.slane %v702_v52, 4 }
 0x213   :  { %v688_v51 = vadd.f32 %v870_v27, %v687_v50 }
 0x214   :  { %v704_v58 = vmax.f32 %v702_v52, %v703_v54 }
 0x215   :  { %v696_v53 = vmax.f32 %v688_v51, 0.0 }
 0x216   :  { %v705_v63 = vrot.slane %v704_v58, 2 }
 0x217   :  { %v710_v56 = vsel %vm101_vm2, %v696_v53, -inf }
 0x218   :  { %v712_v61 = vmax.f32 %v709_v59, %v710_v56  ;;  %v706_v3 = vmax.f32 %v704_v58, %v705_v63 }
 0x21a   :  { %v690_v55 = vpop.f32.mrf.mxu3  ;;  %v707_v7 = vrot.slane %v706_v3, 1 }
 0x21b   :  { %v691_v57 = vadd.f32 %v870_v27, %v690_v55 }
 0x21c   :  { %v708_v10 = vmax.f32 %v706_v3, %v707_v7 }
 0x21d   :  { %v697_v60 = vmax.f32 %v691_v57, 0.0 }
 0x21f   :  { %v711_v62 = vsel %vm189_vm4, %v697_v60, -inf }
 0x220   :  { %v713_v0 = vmax.f32 %v712_v61, %v711_v62 }
 0x222   :  { %v714_v1 = vrot.slane %v713_v0, 4 }
 0x224   :  { %v715_v5 = vmax.f32 %v713_v0, %v714_v1 }
 0x226   :  { %v716_v6 = vrot.slane %v715_v5, 2 }
 0x228   :  { %v717_v8 = vmax.f32 %v715_v5, %v716_v6 }
 0x22a   :  { %v718_v9 = vrot.slane %v717_v8, 1 }
 0x22c   :  { %v719_v11 = vmax.f32 %v717_v8, %v718_v9 }
 0x22e   :  { %v720_v12 = vsel %vm123_vm9, %v708_v10, %v719_v11 }
 0x22f   :  { %863 = vmatmul.msk.f32.vlgmr.msra.gmra.mxu2 %vm101_vm2, %v720_v12 }
 0x28c   :  { %v624_v13 = vpop.f32.mrf.mxu0 }
 0x28d   :  { %v627_v14 = vadd.f32 %v624_v13, %v1383_v4 }
 0x2b2   :  { %v752_v16 = vpop.f32.mrf.mxu2 }
 0x2b3   :  { %v755_v17 = vadd.f32 %v752_v16, %v627_v14 }
 0x2b5   :  { %v760_v18 = vadd.f32 %v871_v15, %v755_v17 }
 0x2b7   :  { %762 = vst.msk [vmem:[#allocation2] sm:$0x3] %vm761_vm13, %v760_v18 }
 0x2b8   :  { %773 = dma.vmem_to_hbm [thread:$0]  %s769_s28, 32, %s771_s30, [#allocation3]  }
 0x2b9   :  { %896 = dma.done.wait [#allocation3], 32  }
 0x2ba   :  { %897 = vsyncadd [#allocation3], 4294967264 }
 0x2bb   :  { %778 = vsyncpa [#allocation3], 1 }

</bundles_post_ra>
